<compile_context>
chip_gen: v5e
topology: v5e:2x2
jax: 0.10.0
libtpu: 0.0.40
codegen_flags: <defaults>
</compile_context>

<pallas_src>
import functools

import jax
import jax.numpy as jnp
from jax.experimental import pallas as pl
from jax.experimental.pallas import tpu as pltpu


def _round_up(x, m):
    return ((x + m - 1) // m) * m


# ------------------------------------------------------------------
# Kernel 1: conv_tbc  (training path of LinearizedConvolution.forward)
# ------------------------------------------------------------------
def _conv_tbc_kernel(x_ref, halo_ref, w_ref, b_ref, o_ref, acc_ref, *,
                     kw, row_shift, fused):
    """One (tile_m, Cout) tile of the flattened TBC convolution.

    x_ref:    (tile_m, Cin)          flat time*batch rows of the padded input
    halo_ref: (1, halo_rows, Cin)    the next (kw-1)*B rows (per-tile halo)
    w_ref:    (kw*Cin, Cout) if fused else (kw, Cin, Cout)   -- resident
    b_ref:    (1, Cout)                                      -- resident
    o_ref:    (tile_m, Cout)
    acc_ref:  (tile_m, Cout) f32 VMEM scratch accumulator (tap-loop path only)
    """
    tile_m = o_ref.shape[0]
    bias = b_ref[...].astype(jnp.float32)           # (1, Cout), broadcasts over rows
    x = x_ref[...]                                   # (tile_m, Cin)
    if kw > 1:
        # Append the halo so taps k=1..kw-1 can read rows past the tile edge.
        x = jnp.concatenate([x, halo_ref[0]], axis=0)   # (tile_m + (kw-1)*B, Cin)

    if fused:
        # Single MXU call per tile: im2col the tile to (tile_m, kw*Cin) and hit the
        # reshaped weight once (one weight push / one result drain, K = kw*Cin).
        if kw > 1:
            cols = [x[k * row_shift:k * row_shift + tile_m, :] for k in range(kw)]
            x = jnp.concatenate(cols, axis=-1)           # (tile_m, kw*Cin)
        acc = jnp.dot(x, w_ref[...], preferred_element_type=jnp.float32)
        o_ref[...] = (acc + bias).astype(o_ref.dtype)
    else:
        # Sub-128 Cin: keep kw dots against the resident 3-D weight and accumulate in
        # an f32 VMEM scratch (avoids unaligned lane concatenation and vreg spills).
        acc_ref[...] = jnp.dot(x[:tile_m, :], w_ref[0],
                               preferred_element_type=jnp.float32)
        for k in range(1, kw):
            acc_ref[...] += jnp.dot(x[k * row_shift:k * row_shift + tile_m, :],
                                    w_ref[k], preferred_element_type=jnp.float32)
        o_ref[...] = (acc_ref[...] + bias).astype(o_ref.dtype)


def conv_tbc_pallas(x_tbc, weight, bias, padding, *, tile_m_target=512):
    """Equivalent of torch's input.conv_tbc(weight, bias, padding).

    x_tbc:  (T, B, Cin)   Time x Batch x Channel
    weight: (kw, Cin, Cout)
    bias:   (Cout,)
    returns (T + 2*padding - kw + 1, B, Cout)
    """
    T, B, Cin = x_tbc.shape
    kw, _, Cout = weight.shape
    t_out = T + 2 * padding - kw + 1

    # Flat row space: row m = t*B + b.  Tap k of output row m reads input row m + k*B.
    M = t_out * B
    tile_m = _round_up(min(tile_m_target, _round_up(M, 8)), 8)
    M_pad = _round_up(M, tile_m)
    num_tiles = M_pad // tile_m
    halo_rows = max(kw - 1, 1) * B

    # Zero-pad the time axis: `padding` in front (conv semantics) and enough at the
    # back to cover the M-tiling + halo.  (T, B, C) -> (T_pad*B, C) is a free reshape.
    rows_needed = M_pad + halo_rows
    t_pad_total = -(-rows_needed // B)
    pad_back = t_pad_total - padding - T
    x_pad = jnp.pad(x_tbc, ((padding, pad_back), (0, 0), (0, 0)))
    x_flat = x_pad.reshape(-1, Cin)                          # (t_pad_total*B, Cin)

    # Halo rows for tile i are x_flat[(i+1)*tile_m : (i+1)*tile_m + halo_rows]
    # (a tiny gather: ~ (kw-1)*B/tile_m of the activation bytes).
    halo_idx = ((jnp.arange(num_tiles, dtype=jnp.int32)[:, None] + 1) * tile_m
                + jnp.arange(halo_rows, dtype=jnp.int32)[None, :])
    halo = x_flat[halo_idx]                                  # (num_tiles, halo_rows, Cin)

    fuse_taps = (kw == 1) or (Cin % 128 == 0)
    if fuse_taps:
        w_arg = weight.reshape(kw * Cin, Cout)               # free reshape
        w_spec = pl.BlockSpec((kw * Cin, Cout), lambda i: (0, 0))
    else:
        w_arg = weight
        w_spec = pl.BlockSpec((kw, Cin, Cout), lambda i: (0, 0, 0))

    kernel = functools.partial(_conv_tbc_kernel, kw=kw, row_shift=B, fused=fuse_taps)
    out_flat = pl.pallas_call(
        kernel,
        out_shape=jax.ShapeDtypeStruct((M_pad, Cout), x_tbc.dtype),
        grid=(num_tiles,),
        in_specs=[
            pl.BlockSpec((tile_m, Cin), lambda i: (i, 0)),
            pl.BlockSpec((1, halo_rows, Cin), lambda i: (i, 0, 0)),
            w_spec,                                          # constant -> stays resident
            pl.BlockSpec((1, Cout), lambda i: (0, 0)),
        ],
        out_specs=pl.BlockSpec((tile_m, Cout), lambda i: (i, 0)),
        scratch_shapes=[pltpu.VMEM((tile_m, Cout), jnp.float32)],
        compiler_params=pltpu.CompilerParams(
            dimension_semantics=("parallel",),               # M tiles split across TCs
            vmem_limit_bytes=64 * 1024 * 1024,
        ),
    )(x_flat, halo, w_arg, bias.reshape(1, Cout))

    return out_flat[:M].reshape(t_out, B, Cout)              # free reshape back to TBC


@functools.partial(jax.jit, static_argnames=("padding",))
def linearized_conv_train(x_tbc, weight, bias, *, padding):
    """LinearizedConvolution.forward with incremental_state=None (TBC in/out)."""
    out = conv_tbc_pallas(x_tbc, weight, bias, padding)
    kw = weight.shape[0]
    if kw > 1 and padding > 0:
        out = out[:-padding, :, :]
    return out


# ------------------------------------------------------------------
# Kernel 2: incremental decode step (F.linear path, buffer fused in-kernel)
# ------------------------------------------------------------------
def _decode_step_kernel(x_ref, buf_ref, w_ref, b_ref, out_ref, newbuf_ref, *, kw):
    """One generated token.

    x_ref:      (B, Cin)        newest input frame
    buf_ref:    (kw, B, Cin)    rolling buffer, slot 0 = oldest frame
    w_ref:      (kw, Cin, Cout) native weight layout (no per-token reshape)
    b_ref:      (1, Cout)
    out_ref:    (B, Cout)
    newbuf_ref: (kw, B, Cin)    aliased in place with buf_ref (input_output_aliases)
    """
    frames = [buf_ref[k + 1] for k in range(kw - 1)] + [x_ref[...]]
    # In-kernel buffer shift (replaces the per-token jnp.concatenate in XLA).
    for k in range(kw):
        newbuf_ref[k] = frames[k]
    acc = jnp.dot(frames[0], w_ref[0], preferred_element_type=jnp.float32)
    for k in range(1, kw):
        acc = acc + jnp.dot(frames[k], w_ref[k], preferred_element_type=jnp.float32)
    out_ref[...] = (acc + b_ref[...].astype(jnp.float32)).astype(out_ref.dtype)


def init_decode_buffer(batch, kernel_size, in_channels, dtype=jnp.float32):
    """Fresh rolling input buffer for incremental generation: (kw, B, Cin) zeros."""
    return jnp.zeros((kernel_size, batch, in_channels), dtype)


def _linearized_conv_step_impl(x_step_btc, input_buffer, weight, bias):
    """LinearizedConvolution.forward with incremental_state (one frame, BTC input).

    x_step_btc:   (B, T, Cin)  -- only the last frame is used (as in PyTorch).
    input_buffer: (kw, B, Cin) rolling buffer (functional state, updated in place).
    returns (out (B, 1, Cout), new_buffer)
    """
    B, _, Cin = x_step_btc.shape
    kw, _, Cout = weight.shape
    x_new = x_step_btc[:, -1, :]                             # (B, Cin)

    out, new_buf = pl.pallas_call(
        functools.partial(_decode_step_kernel, kw=kw),
        out_shape=(jax.ShapeDtypeStruct((B, Cout), x_step_btc.dtype),
                   jax.ShapeDtypeStruct((kw, B, Cin), input_buffer.dtype)),
        grid=(1,),
        in_specs=[
            pl.BlockSpec((B, Cin), lambda i: (0, 0)),
            pl.BlockSpec((kw, B, Cin), lambda i: (0, 0, 0)),
            pl.BlockSpec((kw, Cin, Cout), lambda i: (0, 0, 0)),
            pl.BlockSpec((1, Cout), lambda i: (0, 0)),
        ],
        out_specs=(pl.BlockSpec((B, Cout), lambda i: (0, 0)),
                   pl.BlockSpec((kw, B, Cin), lambda i: (0, 0, 0))),
        input_output_aliases={1: 1},                         # buffer updated in place
        compiler_params=pltpu.CompilerParams(
            dimension_semantics=("arbitrary",)),
    )(x_new, input_buffer, weight, bias.reshape(1, Cout))

    return out.reshape(B, 1, Cout), new_buf


# Donating the buffer makes the pallas-level alias a true in-place HBM update per token.
linearized_conv_step = jax.jit(_linearized_conv_step_impl, donate_argnums=(1,))

# TODO(synk): reorder_incremental_state / incremental_state dict plumbing and the
# backward-hook weight-cache invalidation are framework-state concerns with no kernel
# equivalent; the rolling buffer is returned as explicit functional state instead.


# ------------------------------------------------------------------
# Reference (plain JAX) for checking
# ------------------------------------------------------------------
def conv_tbc_ref(x_tbc, weight, bias, padding):
    T, B, Cin = x_tbc.shape
    kw, _, Cout = weight.shape
    t_out = T + 2 * padding - kw + 1
    x_pad = jnp.pad(x_tbc, ((padding, padding), (0, 0), (0, 0)))
    out = jnp.zeros((t_out, B, Cout), jnp.float32)
    for k in range(kw):
        out = out + jnp.einsum("tbc,co->tbo", x_pad[k:k + t_out], weight[k])
    return out + bias[None, None, :]


if __name__ == "__main__":
    # Module config (kernel_size > 1, causal padding = kw - 1 as in fairseq decoders)
    in_channels, out_channels, kernel_size, padding = 4, 8, 3, 2
    T, B = 8, 2

    key = jax.random.PRNGKey(0)
    k_w, k_b, k_x = jax.random.split(key, 3)
    weight = jax.random.normal(k_w, (kernel_size, in_channels, out_channels),
                               jnp.float32) * 0.1
    bias = jax.random.normal(k_b, (out_channels,), jnp.float32) * 0.1

    # ---- training path: Time x Batch x Channel ----
    x_tbc = jax.random.normal(k_x, (T, B, in_channels), jnp.float32)
    out_train = linearized_conv_train(x_tbc, weight, bias, padding=padding)
    out_train = jax.block_until_ready(out_train)

    ref_full = conv_tbc_ref(x_tbc, weight, bias, padding)
    ref_train = ref_full[:-padding] if (kernel_size > 1 and padding > 0) else ref_full
    assert out_train.shape == ref_train.shape, (out_train.shape, ref_train.shape)
    assert jnp.allclose(out_train, ref_train, atol=1e-5, rtol=1e-5)

    # ---- incremental path: Batch x Time x Channel, one frame at a time ----
    x_btc = jnp.transpose(x_tbc, (1, 0, 2))                      # (B, T, Cin)
    buf = init_decode_buffer(B, kernel_size, in_channels, jnp.float32)
    steps = []
    for t in range(T):
        step_out, buf = linearized_conv_step(x_btc[:, t:t + 1, :], buf, weight, bias)
        steps.append(step_out)
    inc_out = jax.block_until_ready(jnp.concatenate(steps, axis=1))  # (B, T, Cout)

    # Incremental generation must match the causal (trimmed) training conv.
    assert jnp.allclose(inc_out, jnp.transpose(ref_train, (1, 0, 2)),
                        atol=1e-5, rtol=1e-5)

    print("KERNEL_OK")
</pallas_src>

<mosaic_0001>
module attributes {stable_mosaic.version = 11 : i64} {
  func.func @_conv_tbc_kernel(%arg0: i32, %arg1: memref<24x4xf32, #tpu.memory_space<vmem>>, %arg2: memref<1x4x4xf32, #tpu.memory_space<vmem>>, %arg3: memref<3x4x8xf32, #tpu.memory_space<vmem>>, %arg4: memref<1x8xf32, #tpu.memory_space<vmem>>, %arg5: memref<24x8xf32, #tpu.memory_space<vmem>>, %arg6: memref<24x8xf32, #tpu.memory_space<vmem>>) attributes {dimension_semantics = [#tpu.dimension_semantics<parallel>], iteration_bounds = array<i64: 1>, scalar_prefetch = 0 : i64, scratch_operands = 1 : i64, tpu.core_type = #tpu.core_type<tc>, window_params = [{transform_indices = @transform_0, window_bounds = array<i64: 24, 4>}, {transform_indices = @transform_1, window_bounds = array<i64: 1, 4, 4>}, {pipeline_mode = #tpu.pipeline_mode<synchronous>, transform_indices = @transform_2, window_bounds = array<i64: 3, 4, 8>}, {pipeline_mode = #tpu.pipeline_mode<synchronous>, transform_indices = @transform_3, window_bounds = array<i64: 1, 8>}, {transform_indices = @transform_4, window_bounds = array<i64: 24, 8>}]} {
    %c0 = arith.constant 0 : index
    %c0_0 = arith.constant 0 : index
    %0 = vector.load %arg4[%c0, %c0_0] : memref<1x8xf32, #tpu.memory_space<vmem>>, vector<1x8xf32>
    %c0_1 = arith.constant 0 : index
    %c0_2 = arith.constant 0 : index
    %1 = vector.load %arg1[%c0_1, %c0_2] : memref<24x4xf32, #tpu.memory_space<vmem>>, vector<24x4xf32>
    %c0_3 = arith.constant 0 : index
    %c0_4 = arith.constant 0 : index
    %c0_5 = arith.constant 0 : index
    %2 = vector.load %arg2[%c0_3, %c0_4, %c0_5] : memref<1x4x4xf32, #tpu.memory_space<vmem>>, vector<1x4x4xf32>
    %3 = vector.shape_cast %2 : vector<1x4x4xf32> to vector<4x4xf32>
    %4 = tpu.concatenate %1, %3 in 0 : vector<24x4xf32>, vector<4x4xf32> -> vector<28x4xf32>
    %5 = vector.extract_strided_slice %4 {offsets = [0, 0], sizes = [24, 4], strides = [1, 1]} : vector<28x4xf32> to vector<24x4xf32>
    %c0_6 = arith.constant 0 : index
    %c0_7 = arith.constant 0 : index
    %c0_8 = arith.constant 0 : index
    %6 = vector.load %arg3[%c0_6, %c0_7, %c0_8] : memref<3x4x8xf32, #tpu.memory_space<vmem>>, vector<1x4x8xf32>
    %7 = vector.shape_cast %6 : vector<1x4x8xf32> to vector<4x8xf32>
    %cst = arith.constant dense<0.000000e+00> : vector<24x8xf32>
    %8 = tpu.matmul %5, %7, %cst {dimension_numbers = #tpu.dot_dimension_numbers<[1], [0], [0], [1], [0, 0, 1, 1], [], []>} : vector<24x4xf32>, vector<4x8xf32>, vector<24x8xf32> -> vector<24x8xf32>
    %c0_9 = arith.constant 0 : index
    %c0_10 = arith.constant 0 : index
    %9 = vector.load %arg6[%c0_9, %c0_10] : memref<24x8xf32, #tpu.memory_space<vmem>>, vector<24x8xf32>
    tpu.vector_store %arg6[%c0_9, %c0_10], %8 {strides = array<i32>} : memref<24x8xf32, #tpu.memory_space<vmem>>, vector<24x8xf32>,
    %c0_11 = arith.constant 0 : index
    %c0_12 = arith.constant 0 : index
    %10 = vector.load %arg6[%c0_11, %c0_12] : memref<24x8xf32, #tpu.memory_space<vmem>>, vector<24x8xf32>
    %11 = vector.extract_strided_slice %4 {offsets = [2, 0], sizes = [24, 4], strides = [1, 1]} : vector<28x4xf32> to vector<24x4xf32>
    %c1 = arith.constant 1 : index
    %c0_13 = arith.constant 0 : index
    %c0_14 = arith.constant 0 : index
    %12 = vector.load %arg3[%c1, %c0_13, %c0_14] : memref<3x4x8xf32, #tpu.memory_space<vmem>>, vector<1x4x8xf32>
    %13 = vector.shape_cast %12 : vector<1x4x8xf32> to vector<4x8xf32>
    %cst_15 = arith.constant dense<0.000000e+00> : vector<24x8xf32>
    %14 = tpu.matmul %11, %13, %cst_15 {dimension_numbers = #tpu.dot_dimension_numbers<[1], [0], [0], [1], [0, 0, 1, 1], [], []>} : vector<24x4xf32>, vector<4x8xf32>, vector<24x8xf32> -> vector<24x8xf32>
    %15 = arith.addf %10, %14 : vector<24x8xf32>
    %c0_16 = arith.constant 0 : index
    %c0_17 = arith.constant 0 : index
    %16 = vector.load %arg6[%c0_16, %c0_17] : memref<24x8xf32, #tpu.memory_space<vmem>>, vector<24x8xf32>
    tpu.vector_store %arg6[%c0_16, %c0_17], %15 {strides = array<i32>} : memref<24x8xf32, #tpu.memory_space<vmem>>, vector<24x8xf32>,
    %c0_18 = arith.constant 0 : index
    %c0_19 = arith.constant 0 : index
    %17 = vector.load %arg6[%c0_18, %c0_19] : memref<24x8xf32, #tpu.memory_space<vmem>>, vector<24x8xf32>
    %18 = vector.extract_strided_slice %4 {offsets = [4, 0], sizes = [24, 4], strides = [1, 1]} : vector<28x4xf32> to vector<24x4xf32>
    %c2 = arith.constant 2 : index
    %c0_20 = arith.constant 0 : index
    %c0_21 = arith.constant 0 : index
    %19 = vector.load %arg3[%c2, %c0_20, %c0_21] : memref<3x4x8xf32, #tpu.memory_space<vmem>>, vector<1x4x8xf32>
    %20 = vector.shape_cast %19 : vector<1x4x8xf32> to vector<4x8xf32>
    %cst_22 = arith.constant dense<0.000000e+00> : vector<24x8xf32>
    %21 = tpu.matmul %18, %20, %cst_22 {dimension_numbers = #tpu.dot_dimension_numbers<[1], [0], [0], [1], [0, 0, 1, 1], [], []>} : vector<24x4xf32>, vector<4x8xf32>, vector<24x8xf32> -> vector<24x8xf32>
    %22 = arith.addf %17, %21 : vector<24x8xf32>
    %c0_23 = arith.constant 0 : index
    %c0_24 = arith.constant 0 : index
    %23 = vector.load %arg6[%c0_23, %c0_24] : memref<24x8xf32, #tpu.memory_space<vmem>>, vector<24x8xf32>
    tpu.vector_store %arg6[%c0_23, %c0_24], %22 {strides = array<i32>} : memref<24x8xf32, #tpu.memory_space<vmem>>, vector<24x8xf32>,
    %c0_25 = arith.constant 0 : index
    %c0_26 = arith.constant 0 : index
    %24 = vector.load %arg6[%c0_25, %c0_26] : memref<24x8xf32, #tpu.memory_space<vmem>>, vector<24x8xf32>
    %25 = vector.broadcast %0 : vector<1x8xf32> to vector<24x8xf32>
    %26 = arith.addf %24, %25 : vector<24x8xf32>
    %c0_27 = arith.constant 0 : index
    %c0_28 = arith.constant 0 : index
    %27 = vector.load %arg5[%c0_27, %c0_28] : memref<24x8xf32, #tpu.memory_space<vmem>>, vector<24x8xf32>
    tpu.vector_store %arg5[%c0_27, %c0_28], %26 {strides = array<i32>} : memref<24x8xf32, #tpu.memory_space<vmem>>, vector<24x8xf32>,
    return
  }
  func.func @transform_0(%arg0: i32) -> (i32, i32) {
    %c0_i32 = arith.constant 0 : i32
    %c0_i32_0 = arith.constant 0 : i32
    return %arg0, %c0_i32 : i32, i32
  }
  func.func @transform_1(%arg0: i32) -> (i32, i32, i32) {
    %c0_i32 = arith.constant 0 : i32
    %c0_i32_0 = arith.constant 0 : i32
    %c0_i32_1 = arith.constant 0 : i32
    return %arg0, %c0_i32, %c0_i32_0 : i32, i32, i32
  }
  func.func @transform_2(%arg0: i32) -> (i32, i32, i32) {
    %c0_i32 = arith.constant 0 : i32
    %c0_i32_0 = arith.constant 0 : i32
    %c0_i32_1 = arith.constant 0 : i32
    %c0_i32_2 = arith.constant 0 : i32
    return %c0_i32, %c0_i32_0, %c0_i32_1 : i32, i32, i32
  }
  func.func @transform_3(%arg0: i32) -> (i32, i32) {
    %c0_i32 = arith.constant 0 : i32
    %c0_i32_0 = arith.constant 0 : i32
    %c0_i32_1 = arith.constant 0 : i32
    return %c0_i32, %c0_i32_0 : i32, i32
  }
  func.func @transform_4(%arg0: i32) -> (i32, i32) {
    %c0_i32 = arith.constant 0 : i32
    %c0_i32_0 = arith.constant 0 : i32
    return %arg0, %c0_i32 : i32, i32
  }
}

</mosaic_0001>

<bundles_post_ra>
// kernel: linearized_conv_train.1
= control target key start
LH: loop header
LB: loop body
LE: loop exit
PB: predicated region body
PF: predicated region fallthrough
CT: control target
= control target key end

     0   :  { %vm33_vm0 = vcmask 1043456   ;;  %vm23_vm1 = vcmask 31744   ;;  %vm73_vm2 = vcmask 1045504   ;;  %vm63_vm3 = vcmask 64512   ;;  %s295_s2 = inlined_call_operand.vmem [shape: f32[3,4,8], index: 2, kind: input, shape index: {}]   ;;  %s296_s0 = inlined_call_operand.vmem [shape: f32[28,4], index: 0, kind: input, shape index: {}]   ;;  %s297_s1 = inlined_call_operand.vmem [shape: f32[1,4,4], index: 1, kind: input, shape index: {}]   ;;  %s298_s3 = inlined_call_operand.vmem [shape: f32[1,8], index: 3, kind: input, shape index: {}]   ;;  %s299_s4 = inlined_call_operand.vmem [shape: f32[24,8], index: 4, kind: output, shape index: {}]  }
   0x1   :  { %v22_v0 = vld [vmem:[%s295_s2] sm:$0xf]  ;;  %v19_v2 = vld [vmem:[%s296_s0 + $0x8] sm:$0xff]  ;;  %v195_v7 = vld [vmem:[%s295_s2 + $0x4] sm:$0xf] }
   0x2   :  { %v18_v1 = vld [vmem:[%s296_s0] sm:$0xff]  ;;  %191 = vmatpush.msk.msra.mxu0 %vm33_vm0, %v22_v0  ;;  %205 = vmatpush.msk.msra.mxu3 %vm33_vm0, %v22_v0  ;;  %v75_v5 = vrot.slane %v19_v2, 2  ;;  %v128_v6 = vrot.slane %v19_v2, 4  ;;  %v200_v8 = vld [vmem:[%s295_s2 + $0x8] sm:$0xf]  ;;  %v20_v11 = vld [vmem:[%s296_s0 + $0x10] sm:$0xff] }
   0x3   :  { %v74_v3 = vrot.slane %v18_v1, 2  ;;  %v127_v4 = vrot.slane %v18_v1, 4  ;;  %192 = vmatmul.msk.f32.vlgmr.msra.gmra.mxu0 %vm23_vm1, %v18_v1  ;;  %193 = vmatmul.msk.f32.vlgmr.msra.gmra.mxu3 %vm23_vm1, %v19_v2  ;;  %v77_v12 = vrot.slane %v20_v11, 2  ;;  %v130_v13 = vrot.slane %v20_v11, 4  ;;  %v21_v16 = vld [vmem:[%s297_s1] sm:$0xf] }
   0x4   :  { %196 = vmatpush.msk.msra.mxu1 %vm33_vm0, %v195_v7  ;;  %201 = vmatpush.msk.msra.mxu2 %vm33_vm0, %v200_v8  ;;  %v79_v17 = vrot.slane %v21_v16, 2  ;;  %v132_v18 = vrot.slane %v21_v16, 4  ;;  %v17_v35 = vld [vmem:[%s298_s3] sm:$0x1] }
   0x5   :  { %v76_v9 = vsel %vm73_vm2, %v74_v3, %v75_v5  ;;  %v129_v10 = vsel %vm33_vm0, %v127_v4, %v128_v6  ;;  %v78_v14 = vsel %vm73_vm2, %v75_v5, %v77_v12  ;;  %v131_v15 = vsel %vm33_vm0, %v128_v6, %v130_v13 }
   0x6   :  { %197 = vmatmul.msk.f32.vlgmr.msra.gmra.mxu1 %vm23_vm1, %v76_v9  ;;  %202 = vmatmul.msk.f32.vlgmr.msra.gmra.mxu2 %vm23_vm1, %v129_v10  ;;  %v80_v19 = vsel %vm73_vm2, %v77_v12, %v79_v17  ;;  %v133_v20 = vsel %vm33_vm0, %v130_v13, %v132_v18  ;;  %v179_v39 = vperm.slane %v17_v35, 0 }
   0xb   :  { %194 = vmatmul.msk.f32.gmra.mxu3 %vm23_vm1, %v20_v11 }
   0xe   :  { %198 = vmatmul.msk.f32.gmra.mxu1 %vm23_vm1, %v78_v14  ;;  %203 = vmatmul.msk.f32.gmra.mxu2 %vm23_vm1, %v131_v15 }
  0x16   :  { %199 = vmatmul.msk.f32.gmra.mxu1 %vm23_vm1, %v80_v19  ;;  %204 = vmatmul.msk.f32.gmra.mxu2 %vm23_vm1, %v133_v20 }
  0x80   :  { %v54_v21 = vpop.f32.mrf.mxu0 }
  0x81   :  { %64 = vst.msk [vmem:[#allocation2] sm:$0xff] %vm63_vm3, %v54_v21 }
  0x83   :  { %v107_v22 = vpop.f32.mrf.mxu1 }
  0x86   :  { %v57_v23 = vpop.f32.mrf.mxu3 }
  0x87   :  { %65 = vst.msk [vmem:[#allocation2 + $0x8] sm:$0xff] %vm63_vm3, %v57_v23 }
  0x88   :  { %v67_v24 = vld [vmem:[#allocation2] sm:$0xff] }
  0x89   :  { %v116_v25 = vadd.f32 %v107_v22, %v67_v24  ;;  %v160_v27 = vpop.f32.mrf.mxu2 }
  0x8b   :  { %v110_v26 = vpop.f32.mrf.mxu1  ;;  %119 = vst.msk [vmem:[#allocation2] sm:$0xff] %vm63_vm3, %v116_v25 }
  0x8e   :  { %v60_v28 = vpop.f32.mrf.mxu3  ;;  %v68_v29 = vld [vmem:[#allocation2 + $0x8] sm:$0xff] }
  0x8f   :  { %66 = vst.msk [vmem:[#allocation2 + $0x10] sm:$0xff] %vm63_vm3, %v60_v28  ;;  %v117_v30 = vadd.f32 %v110_v26, %v68_v29 }
  0x91   :  { %120 = vst.msk [vmem:[#allocation2 + $0x8] sm:$0xff] %vm63_vm3, %v117_v30  ;;  %v163_v34 = vpop.f32.mrf.mxu2 }
  0x92   :  { %v122_v31 = vld [vmem:[#allocation2] sm:$0xff] }
  0x93   :  { %v169_v32 = vadd.f32 %v160_v27, %v122_v31  ;;  %v113_v33 = vpop.f32.mrf.mxu1 }
  0x95   :  { %172 = vst.msk [vmem:[#allocation2] sm:$0xff] %vm63_vm3, %v169_v32 }
  0x96   :  { %v69_v36 = vld [vmem:[#allocation2 + $0x10] sm:$0xff] }
  0x97   :  { %v118_v37 = vadd.f32 %v113_v33, %v69_v36 }
  0x98   :  { %v123_v38 = vld [vmem:[#allocation2 + $0x8] sm:$0xff] }
  0x99   :  { %121 = vst.msk [vmem:[#allocation2 + $0x10] sm:$0xff] %vm63_vm3, %v118_v37  ;;  %v170_v40 = vadd.f32 %v163_v34, %v123_v38  ;;  %v166_v43 = vpop.f32.mrf.mxu2 }
  0x9b   :  { %173 = vst.msk [vmem:[#allocation2 + $0x8] sm:$0xff] %vm63_vm3, %v170_v40 }
  0x9c   :  { %v175_v41 = vld [vmem:[#allocation2] sm:$0xff] }
  0x9d   :  { %v181_v42 = vadd.f32 %v179_v39, %v175_v41 }
  0x9f   :  { %184 = vst.msk [vmem:[%s299_s4] sm:$0xff] %vm63_vm3, %v181_v42 }
  0xa0   :  { %v124_v44 = vld [vmem:[#allocation2 + $0x10] sm:$0xff] }
  0xa1   :  { %v171_v45 = vadd.f32 %v166_v43, %v124_v44 }
  0xa2   :  { %v176_v46 = vld [vmem:[#allocation2 + $0x8] sm:$0xff] }
  0xa3   :  { %v182_v47 = vadd.f32 %v179_v39, %v176_v46  ;;  %174 = vst.msk [vmem:[#allocation2 + $0x10] sm:$0xff] %vm63_vm3, %v171_v45 }
  0xa5   :  { %185 = vst.msk [vmem:[%s299_s4 + $0x8] sm:$0xff] %vm63_vm3, %v182_v47 }
  0xaa   :  { %v177_v48 = vld [vmem:[#allocation2 + $0x10] sm:$0xff] }
  0xab   :  { %v183_v49 = vadd.f32 %v179_v39, %v177_v48 }
  0xad   :  { %186 = vst.msk [vmem:[%s299_s4 + $0x10] sm:$0xff] %vm63_vm3, %v183_v49 }

</bundles_post_ra>
